<compile_context>
chip_gen: v5e
topology: v5e:2x2
jax: 0.10.0
libtpu: 0.0.40
codegen_flags: <defaults>
</compile_context>

<pallas_src>
import functools

import jax
import jax.numpy as jnp
from jax.experimental import pallas as pl
from jax.experimental.pallas import tpu as pltpu


def _round_up(x, m):
    return ((x + m - 1) // m) * m


def _qa_mlp_kernel(c_ref, qp_ref, w1c_ref, w2_ref, o_ref):
    # c_ref  : (TILE_N, E)  choice embeddings for this row tile
    # qp_ref : (TILE_N, H)  question @ w1_q + b1, replicated per choice
    # w1c_ref: (E, H)       choice half of fc1 weight (resident across the grid)
    # w2_ref : (1, H)       fc2 weight as a lane-dense row
    # o_ref  : (TILE_N, 1)  per-(batch, choice) logit (fc2 bias added in wrapper)
    h = jnp.dot(c_ref[...], w1c_ref[...], preferred_element_type=jnp.float32)
    h = jnp.maximum(h + qp_ref[...].astype(jnp.float32), 0.0)            # ReLU (VPU)
    # fc2 output width is 1: use VPU mul + XLU lane-reduction, not the MXU.
    y = jnp.sum(h * w2_ref[...].astype(jnp.float32), axis=-1, keepdims=True)
    o_ref[...] = y.astype(o_ref.dtype)


@functools.partial(jax.jit, static_argnames=("tile_n_max",))
def word_embedding_qa_forward(question, choices, w1, b1, w2, b2, *, tile_n_max=1024):
    """question: [B, E], choices: [B, C, E] -> logits [B, C]."""
    B, E = question.shape
    _, C, _ = choices.shape
    H = w1.shape[1]
    N = B * C

    # Split fc1: combined @ w1 == question @ w1[:E] + choices @ w1[E:].
    # Question half is a tiny [B, H] matmul done once here (b1 folded in), so
    # the kernel never streams the E-wide question duplicated C times.
    w1_q = w1[:E]
    w1_c = w1[E:]
    q_proj = question @ w1_q + b1                                        # [B, H]
    q_proj = jnp.broadcast_to(q_proj[:, None, :], (B, C, H)).reshape(N, H)

    choices_flat = choices.reshape(N, E)

    # Row tiling: large tiles to amortize per-step overhead, padded to a
    # multiple of 8 (sublane) / TILE_N. Weights are replicated, not tiled.
    tile_n = min(tile_n_max, _round_up(N, 8))
    n_pad = _round_up(N, tile_n)
    if n_pad != N:
        choices_flat = jnp.pad(choices_flat, ((0, n_pad - N), (0, 0)))
        q_proj = jnp.pad(q_proj, ((0, n_pad - N), (0, 0)))

    itemsize = jnp.dtype(choices_flat.dtype).itemsize
    cost = pl.CostEstimate(
        flops=2 * n_pad * E * H + 3 * n_pad * H,
        transcendentals=0,
        bytes_accessed=(n_pad * E + n_pad * H + E * H + H) * itemsize + n_pad * 4,
    )

    logits = pl.pallas_call(
        _qa_mlp_kernel,
        out_shape=jax.ShapeDtypeStruct((n_pad, 1), jnp.float32),
        grid=(n_pad // tile_n,),
        in_specs=[
            pl.BlockSpec((tile_n, E), lambda i: (i, 0)),   # choices tile
            pl.BlockSpec((tile_n, H), lambda i: (i, 0)),   # q_proj tile
            pl.BlockSpec((E, H), lambda i: (0, 0)),        # w1_c (resident)
            pl.BlockSpec((1, H), lambda i: (0, 0)),        # w2 row (resident)
        ],
        out_specs=pl.BlockSpec((tile_n, 1), lambda i: (i, 0)),
        compiler_params=pltpu.CompilerParams(dimension_semantics=("parallel",)),
        cost_estimate=cost,
    )(choices_flat, q_proj, w1_c, w2.reshape(1, H))

    # fc2 bias added once here (keeps a pointless (1,1) VMEM tile out of the loop).
    return logits[:N, 0].reshape(B, C) + b2[0]


def init_params(key, embedding_dim, hidden_dim):
    """Deterministic init mimicking nn.Linear's U(-1/sqrt(fan_in), 1/sqrt(fan_in))."""
    k1, k2, k3, k4 = jax.random.split(key, 4)
    fan1 = 2 * embedding_dim
    bound1 = 1.0 / jnp.sqrt(fan1)
    w1 = jax.random.uniform(k1, (fan1, hidden_dim), jnp.float32, -bound1, bound1)
    b1 = jax.random.uniform(k2, (hidden_dim,), jnp.float32, -bound1, bound1)
    bound2 = 1.0 / jnp.sqrt(hidden_dim)
    w2 = jax.random.uniform(k3, (hidden_dim, 1), jnp.float32, -bound2, bound2)
    b2 = jax.random.uniform(k4, (1,), jnp.float32, -bound2, bound2)
    return w1, b1, w2, b2


if __name__ == "__main__":
    B, C, E, H = 2, 4, 32, 32  # small shapes consistent with the module
    key = jax.random.PRNGKey(0)
    kq, kc, kp = jax.random.split(key, 3)

    question = jax.random.normal(kq, (B, E), jnp.float32)
    choices = jax.random.normal(kc, (B, C, E), jnp.float32)
    w1, b1, w2, b2 = init_params(kp, E, H)

    out = word_embedding_qa_forward(question, choices, w1, b1, w2, b2)
    jax.block_until_ready(out)

    # Pure-JAX reference check (original concat formulation).
    q_exp = jnp.broadcast_to(question[:, None, :], (B, C, E))
    comb = jnp.concatenate([q_exp, choices], axis=2)
    ref = (jnp.maximum(comb @ w1 + b1, 0.0) @ w2 + b2)[..., 0]
    assert out.shape == (B, C)
    assert jnp.allclose(out, ref, atol=1e-4, rtol=1e-4)

    print("KERNEL_OK")
</pallas_src>

<mosaic_0001>
module attributes {stable_mosaic.version = 11 : i64} {
  func.func @_qa_mlp_kernel(%arg0: i32, %arg1: memref<8x32xf32, #tpu.memory_space<vmem>>, %arg2: memref<8x32xf32, #tpu.memory_space<vmem>>, %arg3: memref<32x32xf32, #tpu.memory_space<vmem>>, %arg4: memref<1x32xf32, #tpu.memory_space<vmem>>, %arg5: memref<8x1xf32, #tpu.memory_space<vmem>>) attributes {dimension_semantics = [#tpu.dimension_semantics<parallel>], iteration_bounds = array<i64: 1>, scalar_prefetch = 0 : i64, scratch_operands = 0 : i64, tpu.core_type = #tpu.core_type<tc>, window_params = [{transform_indices = @transform_0, window_bounds = array<i64: 8, 32>}, {transform_indices = @transform_1, window_bounds = array<i64: 8, 32>}, {pipeline_mode = #tpu.pipeline_mode<synchronous>, transform_indices = @transform_2, window_bounds = array<i64: 32, 32>}, {pipeline_mode = #tpu.pipeline_mode<synchronous>, transform_indices = @transform_3, window_bounds = array<i64: 1, 32>}, {transform_indices = @transform_4, window_bounds = array<i64: 8, 1>}]} {
    %c0 = arith.constant 0 : index
    %c0_0 = arith.constant 0 : index
    %0 = vector.load %arg1[%c0, %c0_0] : memref<8x32xf32, #tpu.memory_space<vmem>>, vector<8x32xf32>
    %c0_1 = arith.constant 0 : index
    %c0_2 = arith.constant 0 : index
    %1 = vector.load %arg3[%c0_1, %c0_2] : memref<32x32xf32, #tpu.memory_space<vmem>>, vector<32x32xf32>
    %cst = arith.constant dense<0.000000e+00> : vector<8x32xf32>
    %2 = tpu.matmul %0, %1, %cst {dimension_numbers = #tpu.dot_dimension_numbers<[1], [0], [0], [1], [0, 0, 1, 1], [], []>} : vector<8x32xf32>, vector<32x32xf32>, vector<8x32xf32> -> vector<8x32xf32>
    %c0_3 = arith.constant 0 : index
    %c0_4 = arith.constant 0 : index
    %3 = vector.load %arg2[%c0_3, %c0_4] : memref<8x32xf32, #tpu.memory_space<vmem>>, vector<8x32xf32>
    %4 = arith.addf %2, %3 : vector<8x32xf32>
    %cst_5 = arith.constant 0.000000e+00 : f32
    %5 = vector.broadcast %cst_5 : f32 to vector<8x32xf32>
    %6 = arith.maximumf %4, %5 : vector<8x32xf32>
    %c0_6 = arith.constant 0 : index
    %c0_7 = arith.constant 0 : index
    %7 = vector.load %arg4[%c0_6, %c0_7] : memref<1x32xf32, #tpu.memory_space<vmem>>, vector<1x32xf32>
    %8 = vector.broadcast %7 : vector<1x32xf32> to vector<8x32xf32>
    %9 = arith.mulf %6, %8 : vector<8x32xf32>
    %cst_8 = arith.constant dense<0.000000e+00> : vector<8xf32>
    %10 = vector.multi_reduction <add>, %9, %cst_8 [1] : vector<8x32xf32> to vector<8xf32>
    %11 = vector.shape_cast %10 : vector<8xf32> to vector<8x1xf32>
    %c0_9 = arith.constant 0 : index
    %c0_10 = arith.constant 0 : index
    %12 = vector.load %arg5[%c0_9, %c0_10] : memref<8x1xf32, #tpu.memory_space<vmem>>, vector<8x1xf32>
    tpu.vector_store %arg5[%c0_9, %c0_10], %11 {strides = array<i32>} : memref<8x1xf32, #tpu.memory_space<vmem>>, vector<8x1xf32>,
    return
  }
  func.func @transform_0(%arg0: i32) -> (i32, i32) {
    %c0_i32 = arith.constant 0 : i32
    %c0_i32_0 = arith.constant 0 : i32
    return %arg0, %c0_i32 : i32, i32
  }
  func.func @transform_1(%arg0: i32) -> (i32, i32) {
    %c0_i32 = arith.constant 0 : i32
    %c0_i32_0 = arith.constant 0 : i32
    return %arg0, %c0_i32 : i32, i32
  }
  func.func @transform_2(%arg0: i32) -> (i32, i32) {
    %c0_i32 = arith.constant 0 : i32
    %c0_i32_0 = arith.constant 0 : i32
    %c0_i32_1 = arith.constant 0 : i32
    return %c0_i32, %c0_i32_0 : i32, i32
  }
  func.func @transform_3(%arg0: i32) -> (i32, i32) {
    %c0_i32 = arith.constant 0 : i32
    %c0_i32_0 = arith.constant 0 : i32
    %c0_i32_1 = arith.constant 0 : i32
    return %c0_i32, %c0_i32_0 : i32, i32
  }
  func.func @transform_4(%arg0: i32) -> (i32, i32) {
    %c0_i32 = arith.constant 0 : i32
    %c0_i32_0 = arith.constant 0 : i32
    return %arg0, %c0_i32 : i32, i32
  }
}

</mosaic_0001>

<bundles_post_ra>
// kernel: word_embedding_qa_forward.1
= control target key start
LH: loop header
LB: loop body
LE: loop exit
PB: predicated region body
PF: predicated region fallthrough
CT: control target
= control target key end

     0   :  { %vm23_vm0 = vcmask 261120   ;;  %vm56_vm1 = vcmask 7168   ;;  %s113_s2 = inlined_call_operand.vmem [shape: f32[32,32], index: 2, kind: input, shape index: {}]   ;;  %s114_s0 = inlined_call_operand.vmem [shape: f32[8,32], index: 0, kind: input, shape index: {}]   ;;  %s115_s3 = inlined_call_operand.vmem [shape: f32[1,32], index: 3, kind: input, shape index: {}]   ;;  %s116_s1 = inlined_call_operand.vmem [shape: f32[8,32], index: 1, kind: input, shape index: {}]   ;;  %s117_s4 = inlined_call_operand.vmem [shape: f32[8,1], index: 4, kind: output, shape index: {}]  }
   0x1   :  { %v21_v0 = vld [vmem:[%s113_s2 + $0x18] sm:$0xff]  ;;  %v20_v1 = vld [vmem:[%s113_s2 + $0x10] sm:$0xff]  ;;  %v19_v2 = vld [vmem:[%s113_s2 + $0x8] sm:$0xff] }
   0x2   :  { %39 = vmatpush.msra.mxu0 %v21_v0  ;;  %v18_v3 = vld [vmem:[%s113_s2] sm:$0xff] }
   0x3   :  { %v17_v4 = vld [vmem:[%s114_s0] sm:$0xff] }
   0x4   :  { %40 = vmatpush.msra.mxu0 %v20_v1  ;;  %v22_v5 = vld [vmem:[%s116_s1] sm:$0xff] }
   0x5   :  { %v63_v8 = vld [vmem:[%s115_s3] ss:$0 sm:$0xff] }
   0x6   :  { %41 = vmatpush.msra.mxu0 %v19_v2 }
   0x8   :  { %42 = vmatpush.msra.mxu0 %v18_v3 }
   0x9   :  { %62 = vmatmul.msk.f32.vlgmr.msra.gmra.mxu0 %vm23_vm0, %v17_v4 }
  0x86   :  { %v44_v6 = vpop.f32.mrf.mxu0 }
  0x87   :  { %v45_v7 = vadd.f32 %v44_v6, %v22_v5 }
  0x89   :  { %v47_v9 = vmax.f32 %v45_v7, 0.0 }
  0x8b   :  { %v52_v10 = vmul.f32 %v63_v8, %v47_v9 }
  0x8d   :  { %v53_v11 = vsel %vm23_vm0, %v52_v10, 0.0 }
  0x8e   :  { %54 = vadd.xlane.f32.xlu0 %v53_v11 }
 0x101   :  { %v55_v12 = vpop.xlane.xlu0 %54 }
 0x102   :  { %57 = vst.msk [vmem:[%s117_s4] sm:$0xff] %vm56_vm1, %v55_v12 }

</bundles_post_ra>
